<compile_context>
chip_gen: v7x
topology: tpu7x:2x2x1
jax: 0.10.0
libtpu: 0.0.40
codegen_flags: <defaults>
</compile_context>

<pallas_src>
import functools
import math

import jax
import jax.numpy as jnp
from jax import lax
from jax.experimental import pallas as pl
from jax.experimental.pallas import tpu as pltpu


# ----------------------------------------------------------------------------
# Blob layout shared by the packer (glue) and the kernel (static slices).
# Every piece starts on an 8-row sublane boundary.
# ----------------------------------------------------------------------------
def _blob_layout(c_in, hidden, n_nodes, num_classes):
    del num_classes  # layout does not depend on it (columns are padded to H)
    H = hidden

    def ceil8(r):
        return -(-r // 8) * 8

    layout = {}
    off = 0

    def add(name, rows):
        nonlocal off
        layout[name] = off
        off += ceil8(rows)

    add("w_in", c_in)
    add("w_g0", H)
    add("w_g1", H)
    add("w_g2", H)
    add("w1", H)
    add("w2", H // 2)
    add("w3", H // 4)
    # one-row params pre-broadcast to n_nodes rows each (aligned region)
    for name in ("b_in", "b_g0", "b_g1", "b_g2",
                 "ln_g0", "ln_g1", "ln_g2",
                 "ln_b0", "ln_b1", "ln_b2",
                 "b1", "b2", "b3"):
        add(name, n_nodes)
    return layout, off


# ----------------------------------------------------------------------------
# Pallas kernel: one graph per grid step, everything VMEM-resident.
# ----------------------------------------------------------------------------
def _gnn_kernel(x_ref, a_ref, p_ref, out_ref, *, c_in, hidden, n_nodes,
                num_classes):
    H = hidden
    H2, H4 = H // 2, H // 4
    N = n_nodes
    eps = 1e-5
    L, _ = _blob_layout(c_in, hidden, n_nodes, num_classes)

    # ---- static, 8-row-aligned slices of the packed BN-folded blob ---------
    w_in = p_ref[L["w_in"]:L["w_in"] + c_in, :]                 # (Cin, H)
    w_g = [p_ref[L[f"w_g{k}"]:L[f"w_g{k}"] + H, :] for k in range(3)]
    w1 = p_ref[L["w1"]:L["w1"] + H, 0:H2]                       # (H, H/2)
    w2 = p_ref[L["w2"]:L["w2"] + H2, 0:H4]                      # (H/2, H/4)
    w3 = p_ref[L["w3"]:L["w3"] + H4, 0:num_classes]             # (H/4, C)

    def bcast(name, cols):  # pre-broadcast (N, cols) one-row params
        return p_ref[L[name]:L[name] + N, 0:cols]

    b_in = bcast("b_in", H)
    b_g = [bcast(f"b_g{k}", H) for k in range(3)]
    ln_g = [bcast(f"ln_g{k}", H) for k in range(3)]
    ln_b = [bcast(f"ln_b{k}", H) for k in range(3)]
    b1 = bcast("b1", H2)
    b2 = bcast("b2", H4)
    b3 = bcast("b3", num_classes)

    x = x_ref[...]          # (N, Cin)  -- leading batch dim squeezed by spec
    a = a_ref[...]          # (N, N)

    def layernorm(v, g, b):
        # centered two-pass form (robust to non-zero means)
        mu = jnp.mean(v, axis=1, keepdims=True)
        d = v - mu
        var = jnp.mean(d * d, axis=1, keepdims=True)
        return d * lax.rsqrt(var + eps) * g + b

    # input_linear + input_bn (folded) + relu   (dropout = identity in eval)
    h = jnp.maximum(
        jnp.dot(x, w_in, preferred_element_type=jnp.float32) + b_in, 0.0)

    # three GCN blocks: A_hat @ (h @ W) + b -> BN(folded) -> relu -> residual -> LN
    for k in range(3):
        hk = jnp.dot(h, w_g[k], preferred_element_type=jnp.float32)
        hk = jnp.dot(a, hk, preferred_element_type=jnp.float32) + b_g[k]
        h = h + jnp.maximum(hk, 0.0)
        h = layernorm(h, ln_g[k], ln_b[k])

    # regulation_win_fc head on ALL N rows (first BN folded into w1/b1).
    # Head + log_softmax are per-row, so gathering game rows in the wrapper
    # afterwards is mathematically identical to gathering before the head.
    z = jnp.maximum(
        jnp.dot(h, w1, preferred_element_type=jnp.float32) + b1, 0.0)
    z = jnp.maximum(
        jnp.dot(z, w2, preferred_element_type=jnp.float32) + b2, 0.0)
    logits = jnp.dot(z, w3, preferred_element_type=jnp.float32) + b3

    # log_softmax over the class dim
    m = jnp.max(logits, axis=1, keepdims=True)
    lse = m + jnp.log(jnp.sum(jnp.exp(logits - m), axis=1, keepdims=True))
    out_ref[...] = logits - lse


def regulation_hockey_gnn_pallas(x, a_hat, blob, game_indices, *, c_in,
                                 hidden, num_classes):
    B, N, _ = x.shape
    rows = blob.shape[0]
    kernel = functools.partial(_gnn_kernel, c_in=c_in, hidden=hidden,
                               n_nodes=N, num_classes=num_classes)

    # rough cost hint so XLA can overlap this small custom call with neighbours
    flops_graph = 2 * N * (c_in * hidden
                           + 3 * (hidden * hidden + N * hidden)
                           + hidden * (hidden // 2)
                           + (hidden // 2) * (hidden // 4)
                           + (hidden // 4) * num_classes)
    cost = pl.CostEstimate(
        flops=B * flops_graph,
        transcendentals=B * N * (num_classes + 4),
        bytes_accessed=int(x.size + a_hat.size + blob.size
                           + B * N * num_classes) * 4)

    out_full = pl.pallas_call(
        kernel,
        grid=(B,),
        out_shape=jax.ShapeDtypeStruct((B, N, num_classes), jnp.float32),
        in_specs=[
            pl.BlockSpec((None, N, c_in), lambda b: (b, 0, 0)),   # per-graph x
            pl.BlockSpec((None, N, N), lambda b: (b, 0, 0)),      # per-graph A_hat
            pl.BlockSpec((rows, hidden), lambda b: (0, 0)),       # shared weights
        ],
        out_specs=pl.BlockSpec((None, N, num_classes), lambda b: (b, 0, 0)),
        compiler_params=pltpu.CompilerParams(
            dimension_semantics=("parallel",)),
        cost_estimate=cost,
    )(x, a_hat, blob)

    # per-row equivalence: select the game rows after the kernel.
    return out_full[:, game_indices, :]


# ----------------------------------------------------------------------------
# Glue: eval-mode BN folding + parameter packing into one aligned blob.
# ----------------------------------------------------------------------------
def _fold(w, b, bn, eps=1e-5):
    gamma, beta, mean, var = bn
    s = gamma / jnp.sqrt(var + eps)
    t = beta - mean * s
    return w * s[None, :], b * s + t


def pack_blob(params, *, c_in, hidden, n_nodes, num_classes):
    H = hidden
    N = n_nodes
    L, total_rows = _blob_layout(c_in, hidden, n_nodes, num_classes)

    w_in_f, b_in_f = _fold(params["w_in"], params["b_in"], params["bn_in"])
    gcn_f = [_fold(params["w_gcn"][k], params["b_gcn"][k], params["bn_gcn"][k])
             for k in range(3)]
    w1_f, b1_f = _fold(params["w1"], params["b1"], params["bn1"])

    blob = jnp.zeros((total_rows, H), jnp.float32)

    def put_w(b, name, mat):
        return b.at[L[name]:L[name] + mat.shape[0], 0:mat.shape[1]].set(mat)

    def put_b(b, name, vec):
        mat = jnp.broadcast_to(vec.reshape(1, -1), (N, vec.shape[0]))
        return b.at[L[name]:L[name] + N, 0:vec.shape[0]].set(mat)

    blob = put_w(blob, "w_in", w_in_f)
    for k in range(3):
        blob = put_w(blob, f"w_g{k}", gcn_f[k][0])
    blob = put_w(blob, "w1", w1_f)
    blob = put_w(blob, "w2", params["w2"])
    blob = put_w(blob, "w3", params["w3"])

    blob = put_b(blob, "b_in", b_in_f)
    for k in range(3):
        blob = put_b(blob, f"b_g{k}", gcn_f[k][1])
        blob = put_b(blob, f"ln_g{k}", params["ln_g"][k])
        blob = put_b(blob, f"ln_b{k}", params["ln_b"][k])
    blob = put_b(blob, "b1", b1_f)
    blob = put_b(blob, "b2", params["b2"])
    blob = put_b(blob, "b3", params["b3"])
    return blob.astype(jnp.float32)


# ----------------------------------------------------------------------------
# Pure-JAX reference (un-folded, original module semantics) for verification.
# ----------------------------------------------------------------------------
def reference_forward(params, x, a_hat, game_indices):
    eps = 1e-5

    def bn(v, p):
        gamma, beta, mean, var = p
        return (v - mean) / jnp.sqrt(var + eps) * gamma + beta

    def ln(v, g, b):
        mu = jnp.mean(v, axis=1, keepdims=True)
        var = jnp.mean((v - mu) ** 2, axis=1, keepdims=True)
        return (v - mu) / jnp.sqrt(var + eps) * g + b

    h = jnp.maximum(bn(x @ params["w_in"] + params["b_in"], params["bn_in"]), 0.0)
    for k in range(3):
        hk = a_hat @ (h @ params["w_gcn"][k]) + params["b_gcn"][k]
        hk = jnp.maximum(bn(hk, params["bn_gcn"][k]), 0.0)
        h = h + hk
        h = ln(h, params["ln_g"][k], params["ln_b"][k])
    xg = h[game_indices]
    z = jnp.maximum(bn(xg @ params["w1"] + params["b1"], params["bn1"]), 0.0)
    z = jnp.maximum(z @ params["w2"] + params["b2"], 0.0)
    logits = z @ params["w3"] + params["b3"]
    return jax.nn.log_softmax(logits, axis=1)


# ----------------------------------------------------------------------------
# Deterministic in-script parameter / input construction.
# ----------------------------------------------------------------------------
class _KeyGen:
    def __init__(self, key):
        self._key = key

    def __call__(self):
        self._key, sub = jax.random.split(self._key)
        return sub


def build_all():
    B, N, C_IN, H, G, NCLS = 8, 16, 8, 32, 4, 2
    H2, H4 = H // 2, H // 4
    kg = _KeyGen(jax.random.PRNGKey(0))

    # batch of node features
    x = jax.random.normal(kg(), (B, N, C_IN), jnp.float32)

    # per-graph random undirected adjacency with self-loops, GCN-normalized:
    # A_hat = D^-1/2 (A + I) D^-1/2
    def make_a_hat(key):
        r = jax.random.uniform(key, (N, N))
        adj = (r < 0.25).astype(jnp.float32)
        adj = jnp.maximum(adj, adj.T)                       # undirected
        adj = adj * (1.0 - jnp.eye(N)) + jnp.eye(N)         # self-loops
        deg = jnp.sum(adj, axis=1)
        dinv = lax.rsqrt(deg)
        return dinv[:, None] * adj * dinv[None, :]

    a_hat = jax.vmap(make_a_hat)(jax.random.split(kg(), B))

    game_indices = jnp.array([0, 2, 5, 9], jnp.int32)

    def lin_w(fan_in, shape):
        lim = 1.0 / math.sqrt(fan_in)
        return jax.random.uniform(kg(), shape, jnp.float32, -lim, lim)

    def bn_params(c):
        gamma = 1.0 + 0.1 * jax.random.normal(kg(), (c,), jnp.float32)
        beta = 0.1 * jax.random.normal(kg(), (c,), jnp.float32)
        mean = 0.1 * jax.random.normal(kg(), (c,), jnp.float32)
        var = 1.0 + 0.1 * jnp.abs(jax.random.normal(kg(), (c,), jnp.float32))
        return gamma, beta, mean, var

    params = dict(
        w_in=lin_w(C_IN, (C_IN, H)), b_in=lin_w(C_IN, (H,)), bn_in=bn_params(H),
        w_gcn=[lin_w(H, (H, H)) for _ in range(3)],
        b_gcn=[lin_w(H, (H,)) for _ in range(3)],
        bn_gcn=[bn_params(H) for _ in range(3)],
        ln_g=[1.0 + 0.05 * jax.random.normal(kg(), (H,), jnp.float32) for _ in range(3)],
        ln_b=[0.05 * jax.random.normal(kg(), (H,), jnp.float32) for _ in range(3)],
        w1=lin_w(H, (H, H2)), b1=lin_w(H, (H2,)), bn1=bn_params(H2),
        w2=lin_w(H2, (H2, H4)), b2=lin_w(H2, (H4,)),
        w3=lin_w(H4, (H4, NCLS)), b3=lin_w(H4, (NCLS,)),
    )
    dims = dict(c_in=C_IN, hidden=H, num_classes=NCLS)
    return dims, params, x, a_hat, game_indices


if __name__ == "__main__":
    dims, params, x, a_hat, game_indices = build_all()
    B, N, _ = x.shape
    blob = pack_blob(params, c_in=dims["c_in"], hidden=dims["hidden"],
                     n_nodes=N, num_classes=dims["num_classes"])

    out = regulation_hockey_gnn_pallas(x, a_hat, blob, game_indices, **dims)
    out = jax.block_until_ready(out)

    ref = jax.vmap(lambda xb, ab: reference_forward(params, xb, ab,
                                                    game_indices))(x, a_hat)
    assert out.shape == (B, game_indices.shape[0], dims["num_classes"])
    assert jnp.allclose(out, ref, atol=5e-4, rtol=5e-4), (out, ref)
    # rows of log_softmax must sum to 1 in probability space
    assert jnp.allclose(jnp.sum(jnp.exp(out), axis=-1), 1.0, atol=1e-4)

    # TODO(synk): for real throughput, row-stack graphs to >=256 rows per
    # shared-weight matmul (batched A_hat einsum) to raise MXU utilization.
    print("KERNEL_OK")
</pallas_src>

<mosaic_0001>
module attributes {stable_mosaic.version = 11 : i64} {
  func.func @_gnn_kernel(%arg0: i32, %arg1: memref<1x16x8xf32, #tpu.memory_space<vmem>>, %arg2: memref<1x16x16xf32, #tpu.memory_space<vmem>>, %arg3: memref<368x32xf32, #tpu.memory_space<vmem>>, %arg4: memref<1x16x2xf32, #tpu.memory_space<vmem>>) attributes {dimension_semantics = [#tpu.dimension_semantics<parallel>], iteration_bounds = array<i64: 8>, scalar_prefetch = 0 : i64, scratch_operands = 0 : i64, tpu.core_type = #tpu.core_type<tc>, window_params = [{transform_indices = @transform_0, window_bounds = array<i64: 1, 16, 8>}, {transform_indices = @transform_1, window_bounds = array<i64: 1, 16, 16>}, {pipeline_mode = #tpu.pipeline_mode<synchronous>, transform_indices = @transform_2, window_bounds = array<i64: 368, 32>}, {transform_indices = @transform_3, window_bounds = array<i64: 1, 16, 2>}]} {
    %c0 = arith.constant 0 : index
    %c0_0 = arith.constant 0 : index
    %0 = vector.load %arg3[%c0, %c0_0] : memref<368x32xf32, #tpu.memory_space<vmem>>, vector<8x32xf32>
    %c8 = arith.constant 8 : index
    %c0_1 = arith.constant 0 : index
    %1 = vector.load %arg3[%c8, %c0_1] : memref<368x32xf32, #tpu.memory_space<vmem>>, vector<32x32xf32>
    %c40 = arith.constant 40 : index
    %c0_2 = arith.constant 0 : index
    %2 = vector.load %arg3[%c40, %c0_2] : memref<368x32xf32, #tpu.memory_space<vmem>>, vector<32x32xf32>
    %c72 = arith.constant 72 : index
    %c0_3 = arith.constant 0 : index
    %3 = vector.load %arg3[%c72, %c0_3] : memref<368x32xf32, #tpu.memory_space<vmem>>, vector<32x32xf32>
    %c104 = arith.constant 104 : index
    %c0_4 = arith.constant 0 : index
    %4 = vector.load %arg3[%c104, %c0_4] : memref<368x32xf32, #tpu.memory_space<vmem>>, vector<32x16xf32>
    %c136 = arith.constant 136 : index
    %c0_5 = arith.constant 0 : index
    %5 = vector.load %arg3[%c136, %c0_5] : memref<368x32xf32, #tpu.memory_space<vmem>>, vector<16x8xf32>
    %c152 = arith.constant 152 : index
    %c0_6 = arith.constant 0 : index
    %6 = vector.load %arg3[%c152, %c0_6] : memref<368x32xf32, #tpu.memory_space<vmem>>, vector<8x2xf32>
    %c160 = arith.constant 160 : index
    %c0_7 = arith.constant 0 : index
    %7 = vector.load %arg3[%c160, %c0_7] : memref<368x32xf32, #tpu.memory_space<vmem>>, vector<16x32xf32>
    %c176 = arith.constant 176 : index
    %c0_8 = arith.constant 0 : index
    %8 = vector.load %arg3[%c176, %c0_8] : memref<368x32xf32, #tpu.memory_space<vmem>>, vector<16x32xf32>
    %c192 = arith.constant 192 : index
    %c0_9 = arith.constant 0 : index
    %9 = vector.load %arg3[%c192, %c0_9] : memref<368x32xf32, #tpu.memory_space<vmem>>, vector<16x32xf32>
    %c208 = arith.constant 208 : index
    %c0_10 = arith.constant 0 : index
    %10 = vector.load %arg3[%c208, %c0_10] : memref<368x32xf32, #tpu.memory_space<vmem>>, vector<16x32xf32>
    %c224 = arith.constant 224 : index
    %c0_11 = arith.constant 0 : index
    %11 = vector.load %arg3[%c224, %c0_11] : memref<368x32xf32, #tpu.memory_space<vmem>>, vector<16x32xf32>
    %c240 = arith.constant 240 : index
    %c0_12 = arith.constant 0 : index
    %12 = vector.load %arg3[%c240, %c0_12] : memref<368x32xf32, #tpu.memory_space<vmem>>, vector<16x32xf32>
    %c256 = arith.constant 256 : index
    %c0_13 = arith.constant 0 : index
    %13 = vector.load %arg3[%c256, %c0_13] : memref<368x32xf32, #tpu.memory_space<vmem>>, vector<16x32xf32>
    %c272 = arith.constant 272 : index
    %c0_14 = arith.constant 0 : index
    %14 = vector.load %arg3[%c272, %c0_14] : memref<368x32xf32, #tpu.memory_space<vmem>>, vector<16x32xf32>
    %c288 = arith.constant 288 : index
    %c0_15 = arith.constant 0 : index
    %15 = vector.load %arg3[%c288, %c0_15] : memref<368x32xf32, #tpu.memory_space<vmem>>, vector<16x32xf32>
    %c304 = arith.constant 304 : index
    %c0_16 = arith.constant 0 : index
    %16 = vector.load %arg3[%c304, %c0_16] : memref<368x32xf32, #tpu.memory_space<vmem>>, vector<16x32xf32>
    %c320 = arith.constant 320 : index
    %c0_17 = arith.constant 0 : index
    %17 = vector.load %arg3[%c320, %c0_17] : memref<368x32xf32, #tpu.memory_space<vmem>>, vector<16x16xf32>
    %c336 = arith.constant 336 : index
    %c0_18 = arith.constant 0 : index
    %18 = vector.load %arg3[%c336, %c0_18] : memref<368x32xf32, #tpu.memory_space<vmem>>, vector<16x8xf32>
    %c352 = arith.constant 352 : index
    %c0_19 = arith.constant 0 : index
    %19 = vector.load %arg3[%c352, %c0_19] : memref<368x32xf32, #tpu.memory_space<vmem>>, vector<16x2xf32>
    %c0_20 = arith.constant 0 : index
    %c0_21 = arith.constant 0 : index
    %c0_22 = arith.constant 0 : index
    %20 = vector.load %arg1[%c0_20, %c0_21, %c0_22] : memref<1x16x8xf32, #tpu.memory_space<vmem>>, vector<1x16x8xf32>
    %21 = vector.shape_cast %20 : vector<1x16x8xf32> to vector<16x8xf32>
    %c0_23 = arith.constant 0 : index
    %c0_24 = arith.constant 0 : index
    %c0_25 = arith.constant 0 : index
    %22 = vector.load %arg2[%c0_23, %c0_24, %c0_25] : memref<1x16x16xf32, #tpu.memory_space<vmem>>, vector<1x16x16xf32>
    %23 = vector.shape_cast %22 : vector<1x16x16xf32> to vector<16x16xf32>
    %cst = arith.constant dense<0.000000e+00> : vector<16x32xf32>
    %24 = tpu.matmul %21, %0, %cst {dimension_numbers = #tpu.dot_dimension_numbers<[1], [0], [0], [1], [0, 0, 1, 1], [], []>} : vector<16x8xf32>, vector<8x32xf32>, vector<16x32xf32> -> vector<16x32xf32>
    %25 = arith.addf %24, %7 : vector<16x32xf32>
    %cst_26 = arith.constant 0.000000e+00 : f32
    %26 = vector.broadcast %cst_26 : f32 to vector<16x32xf32>
    %27 = arith.maximumf %25, %26 : vector<16x32xf32>
    %cst_27 = arith.constant dense<0.000000e+00> : vector<16x32xf32>
    %28 = tpu.matmul %27, %1, %cst_27 {dimension_numbers = #tpu.dot_dimension_numbers<[1], [0], [0], [1], [0, 0, 1, 1], [], []>} : vector<16x32xf32>, vector<32x32xf32>, vector<16x32xf32> -> vector<16x32xf32>
    %cst_28 = arith.constant dense<0.000000e+00> : vector<16x32xf32>
    %29 = tpu.matmul %23, %28, %cst_28 {dimension_numbers = #tpu.dot_dimension_numbers<[1], [0], [0], [1], [0, 0, 1, 1], [], []>} : vector<16x16xf32>, vector<16x32xf32>, vector<16x32xf32> -> vector<16x32xf32>
    %30 = arith.addf %29, %8 : vector<16x32xf32>
    %cst_29 = arith.constant 0.000000e+00 : f32
    %31 = vector.broadcast %cst_29 : f32 to vector<16x32xf32>
    %32 = arith.maximumf %30, %31 : vector<16x32xf32>
    %33 = arith.addf %27, %32 : vector<16x32xf32>
    %cst_30 = arith.constant dense<0.000000e+00> : vector<16xf32>
    %34 = vector.multi_reduction <add>, %33, %cst_30 [1] : vector<16x32xf32> to vector<16xf32>
    %35 = vector.shape_cast %34 : vector<16xf32> to vector<16x1xf32>
    %cst_31 = arith.constant 3.200000e+01 : f32
    %36 = vector.broadcast %cst_31 : f32 to vector<16x1xf32>
    %37 = arith.divf %35, %36 : vector<16x1xf32>
    %38 = vector.broadcast %37 : vector<16x1xf32> to vector<16x32xf32>
    %39 = arith.subf %33, %38 : vector<16x32xf32>
    %40 = arith.mulf %39, %39 : vector<16x32xf32>
    %cst_32 = arith.constant dense<0.000000e+00> : vector<16xf32>
    %41 = vector.multi_reduction <add>, %40, %cst_32 [1] : vector<16x32xf32> to vector<16xf32>
    %42 = vector.shape_cast %41 : vector<16xf32> to vector<16x1xf32>
    %cst_33 = arith.constant 3.200000e+01 : f32
    %43 = vector.broadcast %cst_33 : f32 to vector<16x1xf32>
    %44 = arith.divf %42, %43 : vector<16x1xf32>
    %cst_34 = arith.constant 9.99999974E-6 : f32
    %45 = vector.broadcast %cst_34 : f32 to vector<16x1xf32>
    %46 = arith.addf %44, %45 : vector<16x1xf32>
    %47 = math.rsqrt %46 : vector<16x1xf32>
    %48 = vector.broadcast %47 : vector<16x1xf32> to vector<16x32xf32>
    %49 = arith.mulf %39, %48 : vector<16x32xf32>
    %50 = arith.mulf %49, %11 : vector<16x32xf32>
    %51 = arith.addf %50, %14 : vector<16x32xf32>
    %cst_35 = arith.constant dense<0.000000e+00> : vector<16x32xf32>
    %52 = tpu.matmul %51, %2, %cst_35 {dimension_numbers = #tpu.dot_dimension_numbers<[1], [0], [0], [1], [0, 0, 1, 1], [], []>} : vector<16x32xf32>, vector<32x32xf32>, vector<16x32xf32> -> vector<16x32xf32>
    %cst_36 = arith.constant dense<0.000000e+00> : vector<16x32xf32>
    %53 = tpu.matmul %23, %52, %cst_36 {dimension_numbers = #tpu.dot_dimension_numbers<[1], [0], [0], [1], [0, 0, 1, 1], [], []>} : vector<16x16xf32>, vector<16x32xf32>, vector<16x32xf32> -> vector<16x32xf32>
    %54 = arith.addf %53, %9 : vector<16x32xf32>
    %cst_37 = arith.constant 0.000000e+00 : f32
    %55 = vector.broadcast %cst_37 : f32 to vector<16x32xf32>
    %56 = arith.maximumf %54, %55 : vector<16x32xf32>
    %57 = arith.addf %51, %56 : vector<16x32xf32>
    %cst_38 = arith.constant dense<0.000000e+00> : vector<16xf32>
    %58 = vector.multi_reduction <add>, %57, %cst_38 [1] : vector<16x32xf32> to vector<16xf32>
    %59 = vector.shape_cast %58 : vector<16xf32> to vector<16x1xf32>
    %cst_39 = arith.constant 3.200000e+01 : f32
    %60 = vector.broadcast %cst_39 : f32 to vector<16x1xf32>
    %61 = arith.divf %59, %60 : vector<16x1xf32>
    %62 = vector.broadcast %61 : vector<16x1xf32> to vector<16x32xf32>
    %63 = arith.subf %57, %62 : vector<16x32xf32>
    %64 = arith.mulf %63, %63 : vector<16x32xf32>
    %cst_40 = arith.constant dense<0.000000e+00> : vector<16xf32>
    %65 = vector.multi_reduction <add>, %64, %cst_40 [1] : vector<16x32xf32> to vector<16xf32>
    %66 = vector.shape_cast %65 : vector<16xf32> to vector<16x1xf32>
    %cst_41 = arith.constant 3.200000e+01 : f32
    %67 = vector.broadcast %cst_41 : f32 to vector<16x1xf32>
    %68 = arith.divf %66, %67 : vector<16x1xf32>
    %cst_42 = arith.constant 9.99999974E-6 : f32
    %69 = vector.broadcast %cst_42 : f32 to vector<16x1xf32>
    %70 = arith.addf %68, %69 : vector<16x1xf32>
    %71 = math.rsqrt %70 : vector<16x1xf32>
    %72 = vector.broadcast %71 : vector<16x1xf32> to vector<16x32xf32>
    %73 = arith.mulf %63, %72 : vector<16x32xf32>
    %74 = arith.mulf %73, %12 : vector<16x32xf32>
    %75 = arith.addf %74, %15 : vector<16x32xf32>
    %cst_43 = arith.constant dense<0.000000e+00> : vector<16x32xf32>
    %76 = tpu.matmul %75, %3, %cst_43 {dimension_numbers = #tpu.dot_dimension_numbers<[1], [0], [0], [1], [0, 0, 1, 1], [], []>} : vector<16x32xf32>, vector<32x32xf32>, vector<16x32xf32> -> vector<16x32xf32>
    %cst_44 = arith.constant dense<0.000000e+00> : vector<16x32xf32>
    %77 = tpu.matmul %23, %76, %cst_44 {dimension_numbers = #tpu.dot_dimension_numbers<[1], [0], [0], [1], [0, 0, 1, 1], [], []>} : vector<16x16xf32>, vector<16x32xf32>, vector<16x32xf32> -> vector<16x32xf32>
    %78 = arith.addf %77, %10 : vector<16x32xf32>
    %cst_45 = arith.constant 0.000000e+00 : f32
    %79 = vector.broadcast %cst_45 : f32 to vector<16x32xf32>
    %80 = arith.maximumf %78, %79 : vector<16x32xf32>
    %81 = arith.addf %75, %80 : vector<16x32xf32>
    %cst_46 = arith.constant dense<0.000000e+00> : vector<16xf32>
    %82 = vector.multi_reduction <add>, %81, %cst_46 [1] : vector<16x32xf32> to vector<16xf32>
    %83 = vector.shape_cast %82 : vector<16xf32> to vector<16x1xf32>
    %cst_47 = arith.constant 3.200000e+01 : f32
    %84 = vector.broadcast %cst_47 : f32 to vector<16x1xf32>
    %85 = arith.divf %83, %84 : vector<16x1xf32>
    %86 = vector.broadcast %85 : vector<16x1xf32> to vector<16x32xf32>
    %87 = arith.subf %81, %86 : vector<16x32xf32>
    %88 = arith.mulf %87, %87 : vector<16x32xf32>
    %cst_48 = arith.constant dense<0.000000e+00> : vector<16xf32>
    %89 = vector.multi_reduction <add>, %88, %cst_48 [1] : vector<16x32xf32> to vector<16xf32>
    %90 = vector.shape_cast %89 : vector<16xf32> to vector<16x1xf32>
    %cst_49 = arith.constant 3.200000e+01 : f32
    %91 = vector.broadcast %cst_49 : f32 to vector<16x1xf32>
    %92 = arith.divf %90, %91 : vector<16x1xf32>
    %cst_50 = arith.constant 9.99999974E-6 : f32
    %93 = vector.broadcast %cst_50 : f32 to vector<16x1xf32>
    %94 = arith.addf %92, %93 : vector<16x1xf32>
    %95 = math.rsqrt %94 : vector<16x1xf32>
    %96 = vector.broadcast %95 : vector<16x1xf32> to vector<16x32xf32>
    %97 = arith.mulf %87, %96 : vector<16x32xf32>
    %98 = arith.mulf %97, %13 : vector<16x32xf32>
    %99 = arith.addf %98, %16 : vector<16x32xf32>
    %cst_51 = arith.constant dense<0.000000e+00> : vector<16x16xf32>
    %100 = tpu.matmul %99, %4, %cst_51 {dimension_numbers = #tpu.dot_dimension_numbers<[1], [0], [0], [1], [0, 0, 1, 1], [], []>} : vector<16x32xf32>, vector<32x16xf32>, vector<16x16xf32> -> vector<16x16xf32>
    %101 = arith.addf %100, %17 : vector<16x16xf32>
    %cst_52 = arith.constant 0.000000e+00 : f32
    %102 = vector.broadcast %cst_52 : f32 to vector<16x16xf32>
    %103 = arith.maximumf %101, %102 : vector<16x16xf32>
    %cst_53 = arith.constant dense<0.000000e+00> : vector<16x8xf32>
    %104 = tpu.matmul %103, %5, %cst_53 {dimension_numbers = #tpu.dot_dimension_numbers<[1], [0], [0], [1], [0, 0, 1, 1], [], []>} : vector<16x16xf32>, vector<16x8xf32>, vector<16x8xf32> -> vector<16x8xf32>
    %105 = arith.addf %104, %18 : vector<16x8xf32>
    %cst_54 = arith.constant 0.000000e+00 : f32
    %106 = vector.broadcast %cst_54 : f32 to vector<16x8xf32>
    %107 = arith.maximumf %105, %106 : vector<16x8xf32>
    %cst_55 = arith.constant dense<0.000000e+00> : vector<16x2xf32>
    %108 = tpu.matmul %107, %6, %cst_55 {dimension_numbers = #tpu.dot_dimension_numbers<[1], [0], [0], [1], [0, 0, 1, 1], [], []>} : vector<16x8xf32>, vector<8x2xf32>, vector<16x2xf32> -> vector<16x2xf32>
    %109 = arith.addf %108, %19 : vector<16x2xf32>
    %cst_56 = arith.constant dense<0xFF800000> : vector<16xf32>
    %110 = vector.multi_reduction <maximumf>, %109, %cst_56 [1] : vector<16x2xf32> to vector<16xf32>
    %111 = vector.shape_cast %110 : vector<16xf32> to vector<16x1xf32>
    %112 = vector.broadcast %111 : vector<16x1xf32> to vector<16x2xf32>
    %113 = arith.subf %109, %112 : vector<16x2xf32>
    %114 = math.exp %113 : vector<16x2xf32>
    %cst_57 = arith.constant dense<0.000000e+00> : vector<16xf32>
    %115 = vector.multi_reduction <add>, %114, %cst_57 [1] : vector<16x2xf32> to vector<16xf32>
    %116 = vector.shape_cast %115 : vector<16xf32> to vector<16x1xf32>
    %117 = math.log %116 : vector<16x1xf32>
    %118 = arith.addf %111, %117 : vector<16x1xf32>
    %119 = vector.broadcast %118 : vector<16x1xf32> to vector<16x2xf32>
    %120 = arith.subf %109, %119 : vector<16x2xf32>
    %c0_58 = arith.constant 0 : index
    %c0_59 = arith.constant 0 : index
    %c0_60 = arith.constant 0 : index
    %121 = vector.load %arg4[%c0_58, %c0_59, %c0_60] : memref<1x16x2xf32, #tpu.memory_space<vmem>>, vector<1x16x2xf32>
    %122 = vector.shape_cast %121 : vector<1x16x2xf32> to vector<16x2xf32>
    %123 = vector.shape_cast %120 : vector<16x2xf32> to vector<1x16x2xf32>
    tpu.vector_store %arg4[%c0_58, %c0_59, %c0_60], %123 {strides = array<i32>} : memref<1x16x2xf32, #tpu.memory_space<vmem>>, vector<1x16x2xf32>,
    return
  }
  func.func @transform_0(%arg0: i32) -> (i32, i32, i32) {
    %c0_i32 = arith.constant 0 : i32
    %c0_i32_0 = arith.constant 0 : i32
    %c0_i32_1 = arith.constant 0 : i32
    return %arg0, %c0_i32, %c0_i32_0 : i32, i32, i32
  }
  func.func @transform_1(%arg0: i32) -> (i32, i32, i32) {
    %c0_i32 = arith.constant 0 : i32
    %c0_i32_0 = arith.constant 0 : i32
    %c0_i32_1 = arith.constant 0 : i32
    return %arg0, %c0_i32, %c0_i32_0 : i32, i32, i32
  }
  func.func @transform_2(%arg0: i32) -> (i32, i32) {
    %c0_i32 = arith.constant 0 : i32
    %c0_i32_0 = arith.constant 0 : i32
    %c0_i32_1 = arith.constant 0 : i32
    return %c0_i32, %c0_i32_0 : i32, i32
  }
  func.func @transform_3(%arg0: i32) -> (i32, i32, i32) {
    %c0_i32 = arith.constant 0 : i32
    %c0_i32_0 = arith.constant 0 : i32
    %c0_i32_1 = arith.constant 0 : i32
    return %arg0, %c0_i32, %c0_i32_0 : i32, i32, i32
  }
}

</mosaic_0001>

<bundles_post_ra>
// kernel: tpu_custom_call.1
= control target key start
LH: loop header
LB: loop body
LE: loop exit
PB: predicated region body
PF: predicated region fallthrough
CT: control target
= control target key end

     0   :  { %s1515_s12 = smov 0   ;;  %s1726_s0 = inlined_call_operand.vmem [shape: f32[8,16,8], index: 0, kind: input, shape index: {}]   ;;  %s1727_s1 = inlined_call_operand.vmem [shape: f32[8,16,16], index: 1, kind: input, shape index: {}]   ;;  %s1728_s2 = inlined_call_operand.vmem [shape: f32[368,32], index: 2, kind: input, shape index: {}]   ;;  %s1729_s3 = inlined_call_operand.vmem [shape: f32[8,16,2], index: 3, kind: output, shape index: {}]  }
   0x1 LB: > { %s1247_s13 = sadd.s32 4294967295, %s1493_s12   ;;  %p1251_p0 = scmp.ge.s32.totalorder %s1493_s12, 1  ;;  %s1493_s12 = sphi %s1515_s12, %s13_s12  }
   0x2   : > { %p147_p1 = scmp.lt.s32.totalorder %s1493_s12, 9 }
   0x4   : > { %p148_p2 = pnand %p1251_p0, %p147_p1 }
   0x5   : > { %v191_v0 = vld [vmem:[%s1728_s2] sm:$0xff] (!%p148_p2)  ;;  %p176_p3 = scmp.lt.s32.totalorder (!%p148_p2), %s1247_s13, 7  ;;  %v192_v1 = vld [vmem:[%s1728_s2 + $0x8] sm:$0xff] (!%p148_p2)  ;;  %v193_v2 = vld [vmem:[%s1728_s2 + $0x10] sm:$0xff] (!%p148_p2)  ;;  %vm241_vm0 = vcmask (!%p148_p2), 64512   ;;  %vm325_vm1 = vcmask (!%p148_p2), 261120  }
   0x6   : > { %151 = sbr.rel (%p148_p2) target bundleno = 3465 (0xd89), region = 32  ;;  %1329 = vmatprep.subr.mxu0 (!%p148_p2), %v191_v0  ;;  %v1411_v3 = vpack.c.bf16 (!%p148_p2), %v193_v2, %v192_v1  ;;  %v194_v6 = vld [vmem:[%s1728_s2 + $0x18] sm:$0xff] (!%p148_p2)  ;;  %v195_v7 = vld [vmem:[%s1728_s2 + $0x20] sm:$0xff] (!%p148_p2)  ;;  %v212_v9 = vld [vmem:[%s1728_s2 + $0xa8] sm:$0xff] (!%p148_p2)  ;;  %vm407_vm2 = vcmask (!%p148_p2), 130048   ;;  %vm1151_vm3 = vcmask (!%p148_p2), 15360  }
   0x7   : > { %1330 = vmatpush3.msra.mxu0 (!%p148_p2), %v191_v0  ;;  %v1415_v8 = vpack.c.bf16 (!%p148_p2), %v195_v7, %v194_v6  ;;  %v211_v10 = vld [vmem:[%s1728_s2 + $0xa0] sm:$0xff] (!%p148_p2)  ;;  %v214_v22 = vld [vmem:[%s1728_s2 + $0xb8] sm:$0xff] (!%p148_p2)  ;;  %v213_v23 = vld [vmem:[%s1728_s2 + $0xb0] sm:$0xff] (!%p148_p2) }
   0x8   : > { %1412 = vmatprep.subr.bf16.mxu1 (!%p148_p2), %v1411_v3  ;;  %v196_v44 = vld [vmem:[%s1728_s2 + $0x28] sm:$0xff] (!%p148_p2)  ;;  %v197_v45 = vld [vmem:[%s1728_s2 + $0x30] sm:$0xff] (!%p148_p2)  ;;  %v198_v47 = vld [vmem:[%s1728_s2 + $0x38] sm:$0xff] (!%p148_p2) }
   0x9   : > { %1414 = vmatpush3.bf16.msra.mxu1 (!%p148_p2), %v1411_v3  ;;  %v1423_v46 = vpack.c.bf16 (!%p148_p2), %v197_v45, %v196_v44  ;;  %v199_v48 = vld [vmem:[%s1728_s2 + $0x40] sm:$0xff] (!%p148_p2)  ;;  %v225_v59 = vld [vmem:[%s1728_s2 + $0x110] sm:$0xff] (!%p148_p2)  ;;  %v220_v62 = vld [vmem:[%s1728_s2 + $0xe8] sm:$0xff] (!%p148_p2) }
   0xa   : > { %1416 = vmatprep.subr.bf16.mxu1 (!%p148_p2), %v1415_v8  ;;  %v1427_v49 = vpack.c.bf16 (!%p148_p2), %v199_v48, %v198_v47  ;;  %v219_v57 = vld [vmem:[%s1728_s2 + $0xe0] sm:$0xff] (!%p148_p2)  ;;  %v226_v1 = vld [vmem:[%s1728_s2 + $0x118] sm:$0xff] (!%p148_p2)  ;;  %v216_v7 = vld [vmem:[%s1728_s2 + $0xc8] sm:$0xff] (!%p148_p2) }
   0xb   : > { %v227_v48 = vld [vmem:[%s1728_s2 + $0x120] sm:$0xff] (!%p148_p2) }
   0xd   : > { %s1731_s13 = smov (!%p176_p3, %s1247_s13), 7  ;;  %1418 = vmatpush3.bf16.msra.mxu1 %v1415_v8  ;;  %v215_v8 = vld [vmem:[%s1728_s2 + $0xc0] sm:$0xff] }
   0xe   : > { %s1532_s20 = sshll.u32 %s1731_s13, 4 }
   0xf   : > { %s180_s23 = scalar_lea.vmem %s1726_s0, %s1532_s20  ;;  %s185_s7 = scalar_lea.vmem %s1727_s1, %s1532_s20 }
  0x10   : > { %v237_v4 = vld [vmem:[%s180_s23] sm:$0xff]  ;;  %v238_v5 = vld [vmem:[%s180_s23 + $0x8] sm:$0xff]  ;;  %s190_s14 = scalar_lea.vmem %s1729_s3, %s1532_s20 }
  0x11   : > { %1331 = vmatprep.mubr.msk.f32.mxu0 %vm241_vm0, %v237_v4  ;;  %v1558_v17 = vld [vmem:[%s185_s7] sm:$0xff]  ;;  %v1564_v21 = vld [vmem:[%s185_s7 + $0x8] sm:$0xff] }
  0x12   : > { %1332 = vmatmul.mubr.msk.f32.vlgmr.msra.gmra.mrb[0].mxu0 %vm241_vm0, %v238_v5 }
  0x13   : > { %1349 = vmatprep.mubr.msk.f32.mxu0 %vm407_vm2, %v1558_v17 }
  0xe5   : > { %v1333_v11 = vpop.f32.mrb[0].mxu0 }
  0xe6   : > { %v320_v12 = vadd.f32 %v1333_v11, %v212_v9  ;;  %v314_v13 = vpop.f32.mrb[1].mxu0 }
  0xe7   : > { %v315_v14 = vadd.f32 %v314_v13, %v211_v10 }
  0xe8   : > { %v324_v16 = vmax.f32 %v320_v12, 0.0 }
  0xe9   : > { %v323_v15 = vmax.f32 %v315_v14, 0.0 }
  0xeb   : > { %1342 = vmatprep.mubr.msk.f32.mxu1 %vm325_vm1, %v323_v15 }
  0xec   : > { %1343 = vmatmul.mubr.msk.f32.vlgmr.msra.gmra.mrb[0].mxu1 %vm325_vm1, %v324_v16 }
  0xed   : > { %1367 = vmatprep.mubr.msk.f32.mxu1 %vm407_vm2, %v1558_v17 }
 0x1bf   : > { %v1344_v18 = vpop.f32.mrb[0].mxu1 }
 0x1c0   : > { %v398_v19 = vpop.f32.mrb[1].mxu1 }
 0x1c1   : > { %v1419_v20 = vpack.c.bf16 %v1344_v18, %v398_v19 }
 0x1c3   : > { %1420 = vmatprep.subr.bf16.mxu0 %v1419_v20 }
 0x1c4   : > { %1422 = vmatpush3.bf16.msra.mxu0 %v1419_v20 }
 0x1c5   : > { %1424 = vmatprep.subr.bf16.mxu0 %v1423_v46 }
 0x1c7   : > { %1350 = vmatmul.mubr.msk.f32.vlgmr.msra.gmra.mrb[2].mxu0 %vm407_vm2, %v1564_v21 }
 0x1c8   : > { %1426 = vmatpush3.bf16.msra.mxu0 %v1423_v46  ;;  %v221_v46 = vld [vmem:[%s1728_s2 + $0xf0] sm:$0xff] }
 0x1c9   : > { %1428 = vmatprep.subr.bf16.mxu0 %v1427_v49 }
 0x1cc   : > { %1430 = vmatpush3.bf16.msra.mxu0 %v1427_v49 }
 0x29a   : > { %v1351_v24 = vpop.f32.mrb[2].mxu0 }
 0x29b   : > { %v486_v25 = vadd.f32 %v1351_v24, %v214_v22  ;;  %v480_v26 = vpop.f32.mrb[3].mxu0 }
 0x29c   : > { %v481_v27 = vadd.f32 %v480_v26, %v213_v23 }
 0x29d   : > { %v490_v28 = vmax.f32 %v486_v25, 0.0 }
 0x29e   : > { %v489_v29 = vmax.f32 %v481_v27, 0.0 }
 0x29f   : > { %v492_v32 = vadd.f32 %v490_v28, %v324_v16 }
 0x2a0   : > { %v491_v30 = vadd.f32 %v489_v29, %v323_v15 }
 0x2a1   : > { %v496_v33 = vsel %vm325_vm1, %v492_v32, 0.0 }
 0x2a2   : > { %v493_v31 = vsel %vm325_vm1, %v491_v30, 0.0 }
 0x2a3   : > { %494 = vadd.xlane.f32.xlu0 %v493_v31  ;;  %v201_v31 = vld [vmem:[%s1728_s2 + $0x50] sm:$0xff] }
 0x2a7   : > { %497 = vadd.xlane.f32.xlu0 %v496_v33  ;;  %v202_v33 = vld [vmem:[%s1728_s2 + $0x58] sm:$0xff] }
 0x330   : > { %v495_v34 = vpop.xlane.xlu0 %494 }
 0x331   : > { %v500_v35 = vmul.f32 0.03125, %v495_v34  ;;  %v203_v34 = vld [vmem:[%s1728_s2 + $0x60] sm:$0xff] }
 0x333   : > { %v502_v36 = vsub.f32 %v491_v30, %v500_v35  ;;  %v200_v30 = vld [vmem:[%s1728_s2 + $0x48] sm:$0xff]  ;;  %v1439_v35 = vpack.c.bf16 %v203_v34, %v202_v33  ;;  %v229_v33 = vld [vmem:[%s1728_s2 + $0x130] sm:$0xff] }
 0x334   : > { %v498_v37 = vpop.xlane.xlu0 %497 }
 0x335   : > { %v501_v38 = vmul.f32 0.03125, %v498_v37  ;;  %v504_v39 = vmul.f32 %v502_v36, %v502_v36 }
 0x337   : > { %v503_v40 = vsub.f32 %v492_v32, %v501_v38  ;;  %v506_v41 = vsel %vm325_vm1, %v504_v39, 0.0  ;;  %v1435_v32 = vpack.c.bf16 %v201_v31, %v200_v30  ;;  %v223_v31 = vld [vmem:[%s1728_s2 + $0x100] sm:$0xff] }
 0x338   : > { %507 = vadd.xlane.f32.xlu1 %v506_v41 }
 0x339   : > { %v505_v42 = vmul.f32 %v503_v40, %v503_v40 }
 0x33b   : > { %v509_v43 = vsel %vm325_vm1, %v505_v42, 0.0 }
 0x33c   : > { %510 = vadd.xlane.f32.xlu1 %v509_v43  ;;  %v222_v43 = vld [vmem:[%s1728_s2 + $0xf8] sm:$0xff] }
 0x3c5   : > { %v508_v50 = vpop.xlane.xlu1 %507 }
 0x3c6   : > { %v512_v51 = vmul.f32 0.03125, %v508_v50 }
 0x3c8   : > { %v514_v52 = vadd.f32 1e-05, %v512_v51  ;;  %v228_v51 = vld [vmem:[%s1728_s2 + $0x128] sm:$0xff] }
 0x3c9   : > { %v511_v53 = vpop.xlane.xlu1 %510 }
 0x3ca   : > { %1467 = vrsqrt.f32 %v514_v52  ;;  %v513_v54 = vmul.f32 0.03125, %v511_v53 }
 0x3cc   : > { %v515_v55 = vadd.f32 1e-05, %v513_v54 }
 0x3ce   : > { %1469 = vrsqrt.f32 %v515_v55 }
 0x3d4   : > { %v1468_v56 = vpop.eup %1467 }
 0x3d5   : > { %v518_v58 = vmul.f32 %v1468_v56, %v502_v36 }
 0x3d7   : > { %v520_v60 = vmul.f32 %v518_v58, %v219_v57  ;;  %v218_v57 = vld [vmem:[%s1728_s2 + $0xd8] sm:$0xff]  ;;  %v217_v58 = vld [vmem:[%s1728_s2 + $0xd0] sm:$0xff] }
 0x3d8   : > { %v1470_v61 = vpop.eup %1469 }
 0x3d9   : > { %v519_v63 = vmul.f32 %v1470_v61, %v503_v40  ;;  %v522_v0 = vadd.f32 %v520_v60, %v225_v59 }
 0x3db   : > { %1360 = vmatprep.mubr.msk.f32.mxu0 %vm325_vm1, %v522_v0  ;;  %v521_v2 = vmul.f32 %v519_v63, %v220_v62 }
 0x3dd   : > { %v523_v3 = vadd.f32 %v521_v2, %v226_v1 }
 0x3df   : > { %1361 = vmatmul.mubr.msk.f32.vlgmr.msra.gmra.mrb[4].mxu0 %vm325_vm1, %v523_v3 }
 0x3e0   : > { %1385 = vmatprep.mubr.msk.f32.mxu0 %vm407_vm2, %v1558_v17 }
 0x4b2   : > { %v1362_v4 = vpop.f32.mrb[4].mxu0 }
 0x4b3   : > { %v596_v5 = vpop.f32.mrb[5].mxu0 }
 0x4b4   : > { %v1431_v6 = vpack.c.bf16 %v1362_v4, %v596_v5 }
 0x4b6   : > { %1432 = vmatprep.subr.bf16.mxu1 %v1431_v6 }
 0x4b7   : > { %1434 = vmatpush3.bf16.msra.mxu1 %v1431_v6 }
 0x4b8   : > { %1436 = vmatprep.subr.bf16.mxu1 %v1435_v32 }
 0x4ba   : > { %1368 = vmatmul.mubr.msk.f32.vlgmr.msra.gmra.mrb[2].mxu1 %vm407_vm2, %v1564_v21 }
 0x4bb   : > { %1438 = vmatpush3.bf16.msra.mxu1 %v1435_v32 }
 0x4bc   : > { %1440 = vmatprep.subr.bf16.mxu1 %v1439_v35 }
 0x4bf   : > { %1442 = vmatpush3.bf16.msra.mxu1 %v1439_v35 }
 0x58d   : > { %v1369_v9 = vpop.f32.mrb[2].mxu1 }
 0x58e   : > { %v677_v10 = vadd.f32 %v1369_v9, %v216_v7  ;;  %v671_v11 = vpop.f32.mrb[3].mxu1 }
 0x58f   : > { %v672_v12 = vadd.f32 %v671_v11, %v215_v8 }
 0x590   : > { %v681_v13 = vmax.f32 %v677_v10, 0.0 }
 0x591   : > { %v680_v14 = vmax.f32 %v672_v12, 0.0 }
 0x592   : > { %v683_v15 = vadd.f32 %v681_v13, %v523_v3 }
 0x593   : > { %v682_v16 = vadd.f32 %v680_v14, %v522_v0  ;;  %v204_v14 = vld [vmem:[%s1728_s2 + $0x68] sm:$0xff] }
 0x594   : > { %v687_v17 = vsel %vm325_vm1, %v683_v15, 0.0 }
 0x595   : > { %688 = vadd.xlane.f32.xlu1 %v687_v17  ;;  %v684_v18 = vsel %vm325_vm1, %v682_v16, 0.0  ;;  %v206_v17 = vld [vmem:[%s1728_s2 + $0x78] sm:$0xff] }
 0x596   : > { %685 = vadd.xlane.f32.xlu0 %v684_v18  ;;  %v207_v18 = vld [vmem:[%s1728_s2 + $0x80] sm:$0xff] }
 0x622   : > { %v689_v19 = vpop.xlane.xlu1 %688 }
 0x623   : > { %v691_v20 = vmul.f32 0.03125, %v689_v19  ;;  %v686_v22 = vpop.xlane.xlu0 %685  ;;  %v1451_v19 = vpack.c.bf16 %v207_v18, %v206_v17 }
 0x624   : > { %v690_v23 = vmul.f32 0.03125, %v686_v22 }
 0x625   : > { %v693_v24 = vsub.f32 %v683_v15, %v691_v20  ;;  %v205_v15 = vld [vmem:[%s1728_s2 + $0x70] sm:$0xff] }
 0x626   : > { %v692_v25 = vsub.f32 %v682_v16, %v690_v23  ;;  %v1447_v16 = vpack.c.bf16 %v205_v15, %v204_v14 }
 0x627   : > { %v695_v26 = vmul.f32 %v693_v24, %v693_v24 }
 0x628   : > { %v694_v27 = vmul.f32 %v692_v25, %v692_v25 }
 0x629   : > { %v699_v28 = vsel %vm325_vm1, %v695_v26, 0.0 }
 0x62a   : > { %700 = vadd.xlane.f32.xlu1 %v699_v28  ;;  %v696_v29 = vsel %vm325_vm1, %v694_v27, 0.0  ;;  %v224_v28 = vld [vmem:[%s1728_s2 + $0x108] sm:$0xff] }
 0x62b   : > { %697 = vadd.xlane.f32.xlu0 %v696_v29 }
 0x6b7   : > { %v701_v36 = vpop.xlane.xlu1 %700 }
 0x6b8   : > { %v703_v37 = vmul.f32 0.03125, %v701_v36  ;;  %v698_v38 = vpop.xlane.xlu0 %697  ;;  %v230_v36 = vld [vmem:[%s1728_s2 + $0x138] sm:$0xff] }
 0x6b9   : > { %v702_v39 = vmul.f32 0.03125, %v698_v38 }
 0x6ba   : > { %v705_v40 = vadd.f32 1e-05, %v703_v37 }
 0x6bb   : > { %v704_v41 = vadd.f32 1e-05, %v702_v39  ;;  %v208_v39 = vld [vmem:[%s1728_s2 + $0x88] sm:$0xff] }
 0x6bc   : > { %1471 = vrsqrt.f32 %v705_v40  ;;  %v209_v40 = vld [vmem:[%s1728_s2 + $0x90] sm:$0xff] }
 0x6bd   : > { %1473 = vrsqrt.f32 %v704_v41  ;;  %v1455_v41 = vpack.c.bf16 %v209_v40, %v208_v39 }
 0x6bf   : > { %1456 = vmatprep.subr.bf16.mxu1 %v1455_v41 }
 0x6c6   : > { %v1472_v42 = vpop.eup %1471 }
 0x6c7   : > { %v1474_v44 = vpop.eup %1473  ;;  %v709_v45 = vmul.f32 %v1472_v42, %v693_v24  ;;  %v232_v42 = vld [vmem:[%s1728_s2 + $0x148] sm:$0xff] }
 0x6c8   : > { %v708_v47 = vmul.f32 %v1474_v44, %v692_v25 }
 0x6c9   : > { %v711_v49 = vmul.f32 %v709_v45, %v222_v43  ;;  %v231_v43 = vld [vmem:[%s1728_s2 + $0x140] sm:$0xff] }
 0x6ca   : > { %v710_v50 = vmul.f32 %v708_v47, %v221_v46 }
 0x6cb   : > { %v713_v53 = vadd.f32 %v711_v49, %v228_v51  ;;  %v234_v51 = vld [vmem:[%s1728_s2 + $0x158] sm:$0xff] }
 0x6cc   : > { %v712_v52 = vadd.f32 %v710_v50, %v227_v48  ;;  %v210_v50 = vld [vmem:[%s1728_s2 + $0x98] sm:$0xff] }
 0x6ce   : > { %1378 = vmatprep.mubr.msk.f32.mxu1 %vm325_vm1, %v712_v52 }
 0x6cf   : > { %1379 = vmatmul.mubr.msk.f32.vlgmr.msra.gmra.mrb[4].mxu1 %vm325_vm1, %v713_v53 }
 0x6d0   : > { %1458 = vmatpush3.bf16.msra.mxu1 %v1455_v41 }
 0x6d1   : > { %1406 = vmatprep.subr.mxu1 %v210_v50 }
 0x7a2   : > { %v1380_v54 = vpop.f32.mrb[4].mxu1 }
 0x7a3   : > { %v786_v55 = vpop.f32.mrb[5].mxu1 }
 0x7a4   : > { %v1443_v56 = vpack.c.bf16 %v1380_v54, %v786_v55 }
 0x7a6   : > { %1444 = vmatprep.subr.bf16.mxu0 %v1443_v56 }
 0x7a7   : > { %1446 = vmatpush3.bf16.msra.mxu0 %v1443_v56 }
 0x7a8   : > { %1448 = vmatprep.subr.bf16.mxu0 %v1447_v16 }
 0x7aa   : > { %1386 = vmatmul.mubr.msk.f32.vlgmr.msra.gmra.mrb[6].mxu0 %vm407_vm2, %v1564_v21 }
 0x7ab   : > { %1450 = vmatpush3.bf16.msra.mxu0 %v1447_v16 }
 0x7ac   : > { %1452 = vmatprep.subr.bf16.mxu0 %v1451_v19 }
 0x7af   : > { %1454 = vmatpush3.bf16.msra.mxu0 %v1451_v19 }
 0x87d   : > { %v1387_v59 = vpop.f32.mrb[6].mxu0 }
 0x87e   : > { %v867_v60 = vadd.f32 %v1387_v59, %v218_v57  ;;  %v861_v61 = vpop.f32.mrb[7].mxu0  ;;  %v236_v59 = vld [vmem:[%s1728_s2 + $0x168] sm:$0xff] }
 0x87f   : > { %v862_v62 = vadd.f32 %v861_v61, %v217_v58 }
 0x880   : > { %v871_v63 = vmax.f32 %v867_v60, 0.0  ;;  %v235_v60 = vld [vmem:[%s1728_s2 + $0x160] sm:$0xff] }
 0x881   : > { %v870_v0 = vmax.f32 %v862_v62, 0.0 }
 0x882   : > { %v873_v1 = vadd.f32 %v871_v63, %v713_v53 }
 0x883   : > { %v872_v2 = vadd.f32 %v870_v0, %v712_v52  ;;  %v233_v52 = vld [vmem:[%s1728_s2 + $0x150] sm:$0xff] }
 0x884   : > { %v877_v3 = vsel %vm325_vm1, %v873_v1, 0.0 }
 0x885   : > { %878 = vadd.xlane.f32.xlu1 %v877_v3  ;;  %v874_v21 = vsel %vm325_vm1, %v872_v2, 0.0 }
 0x886   : > { %875 = vadd.xlane.f32.xlu0 %v874_v21 }
 0x912   : > { %v879_v4 = vpop.xlane.xlu1 %878 }
 0x913   : > { %v881_v5 = vmul.f32 0.03125, %v879_v4  ;;  %v876_v6 = vpop.xlane.xlu0 %875 }
 0x914   : > { %v880_v7 = vmul.f32 0.03125, %v876_v6 }
 0x915   : > { %v883_v8 = vsub.f32 %v873_v1, %v881_v5 }
 0x916   : > { %v882_v9 = vsub.f32 %v872_v2, %v880_v7 }
 0x917   : > { %v885_v10 = vmul.f32 %v883_v8, %v883_v8 }
 0x918   : > { %v884_v11 = vmul.f32 %v882_v9, %v882_v9 }
 0x919   : > { %v889_v12 = vsel %vm325_vm1, %v885_v10, 0.0 }
 0x91a   : > { %890 = vadd.xlane.f32.xlu1 %v889_v12  ;;  %v886_v13 = vsel %vm325_vm1, %v884_v11, 0.0 }
 0x91b   : > { %887 = vadd.xlane.f32.xlu0 %v886_v13 }
 0x9a7   : > { %v891_v20 = vpop.xlane.xlu1 %890 }
 0x9a8   : > { %v893_v22 = vmul.f32 0.03125, %v891_v20  ;;  %v888_v23 = vpop.xlane.xlu0 %887 }
 0x9a9   : > { %v892_v24 = vmul.f32 0.03125, %v888_v23 }
 0x9aa   : > { %v895_v25 = vadd.f32 1e-05, %v893_v22 }
 0x9ab   : > { %v894_v26 = vadd.f32 1e-05, %v892_v24 }
 0x9ac   : > { %1475 = vrsqrt.f32 %v895_v25 }
 0x9ad   : > { %1477 = vrsqrt.f32 %v894_v26 }
 0x9b6   : > { %v1476_v27 = vpop.eup %1475 }
 0x9b7   : > { %v1478_v29 = vpop.eup %1477  ;;  %v899_v30 = vmul.f32 %v1476_v27, %v883_v8 }
 0x9b8   : > { %v898_v32 = vmul.f32 %v1478_v29, %v882_v9 }
 0x9b9   : > { %v901_v34 = vmul.f32 %v899_v30, %v224_v28 }
 0x9ba   : > { %v900_v35 = vmul.f32 %v898_v32, %v223_v31 }
 0x9bb   : > { %v903_v38 = vadd.f32 %v901_v34, %v230_v36 }
 0x9bc   : > { %v902_v37 = vadd.f32 %v900_v35, %v229_v33 }
 0x9be   : > { %1396 = vmatprep.mubr.msk.f32.mxu0 %vm325_vm1, %v902_v37 }
 0x9bf   : > { %1397 = vmatmul.mubr.msk.f32.vlgmr.msra.gmra.mrb[8].mxu0 %vm325_vm1, %v903_v38 }
 0xa92   : > { %v1398_v44 = vpop.f32.mrb[8].mxu0 }
 0xa93   : > { %v982_v45 = vadd.f32 %v1398_v44, %v232_v42  ;;  %v976_v46 = vpop.f32.mrb[9].mxu0 }
 0xa94   : > { %v977_v47 = vadd.f32 %v976_v46, %v231_v43 }
 0xa95   : > { %v986_v49 = vmax.f32 %v982_v45, 0.0 }
 0xa96   : > { %v985_v48 = vmax.f32 %v977_v47, 0.0 }
 0xa98   : > { %1403 = vmatprep.mubr.msk.f32.mxu1 %vm407_vm2, %v985_v48 }
 0xa99   : > { %1404 = vmatmul.mubr.msk.f32.vlgmr.msra.gmra.mrb[6].mxu1 %vm407_vm2, %v986_v49 }
 0xa9a   : > { %1407 = vmatpush3.msra.mxu1 %v210_v50 }
 0xb6c   : > { %v1405_v53 = vpop.f32.mrb[6].mxu1 }
 0xb6d   : > { %v1065_v54 = vadd.f32 %v1405_v53, %v234_v51  ;;  %v1059_v55 = vpop.f32.mrb[7].mxu1 }
 0xb6e   : > { %v1060_v56 = vadd.f32 %v1059_v55, %v233_v52 }
 0xb6f   : > { %v1069_v58 = vmax.f32 %v1065_v54, 0.0 }
 0xb70   : > { %v1068_v57 = vmax.f32 %v1060_v56, 0.0 }
 0xb72   : > { %1408 = vmatprep.mubr.msk.f32.mxu1 %vm241_vm0, %v1068_v57 }
 0xb73   : > { %1409 = vmatmul.mubr.msk.f32.vlgmr.msra.gmra.mrb[8].mxu1 %vm241_vm0, %v1069_v58 }
 0xc46   : > { %v1410_v61 = vpop.f32.mrb[8].mxu1 }
 0xc47   : > { %v1148_v62 = vadd.f32 %v1410_v61, %v236_v59  ;;  %v1142_v63 = vpop.f32.mrb[9].mxu1 }
 0xc48   : > { %v1143_v0 = vadd.f32 %v1142_v63, %v235_v60 }
 0xc49   : > { %v1155_v1 = vsel %vm1151_vm3, %v1148_v62, -inf }
 0xc4a   : > { %1156 = vmax.xlane.f32.xlu1 %v1155_v1  ;;  %v1152_v2 = vsel %vm1151_vm3, %v1143_v0, -inf }
 0xc4b   : > { %1153 = vmax.xlane.f32.xlu0 %v1152_v2 }
 0xcd7   : > { %v1157_v3 = vpop.xlane.xlu1 %1156 }
 0xcd8   : > { %v1159_v21 = vsub.f32 %v1148_v62, %v1157_v3  ;;  %v1154_v4 = vpop.xlane.xlu0 %1153 }
 0xcd9   : > { %v1158_v5 = vsub.f32 %v1143_v0, %v1154_v4 }
 0xcda   : > { %v1162_v6 = vmul.f32 1.442695, %v1159_v21 }
 0xcdb   : > { %v1160_v7 = vmul.f32 1.442695, %v1158_v5 }
 0xcdc   : > { %1479 = vpow2.f32 %v1162_v6 }
 0xcdd   : > { %1481 = vpow2.f32 %v1160_v7 }
 0xce6   : > { %v1480_v8 = vpop.eup %1479 }
 0xce7   : > { %v1482_v9 = vpop.eup %1481  ;;  %v1167_v10 = vsel %vm1151_vm3, %v1480_v8, 0.0 }
 0xce8   : > { %1168 = vadd.xlane.f32.xlu1 %v1167_v10  ;;  %v1164_v11 = vsel %vm1151_vm3, %v1482_v9, 0.0 }
 0xce9   : > { %1165 = vadd.xlane.f32.xlu0 %v1164_v11 }
 0xd75   : > { %v1169_v12 = vpop.xlane.xlu1 %1168 }
 0xd76   : > { %1483 = vlog2.f32 %v1169_v12  ;;  %v1166_v13 = vpop.xlane.xlu0 %1165 }
 0xd77   : > { %1485 = vlog2.f32 %v1166_v13 }
 0xd80   : > { %v1484_v14 = vpop.eup %1483 }
 0xd81   : > { %v1486_v15 = vpop.eup %1485  ;;  %v1173_v16 = vmul.f32 0.6931472, %v1484_v14 }
 0xd82   : > { %v1171_v17 = vmul.f32 0.6931472, %v1486_v15 }
 0xd83   : > { %v1175_v18 = vadd.f32 %v1173_v16, %v1157_v3 }
 0xd84   : > { %v1174_v19 = vadd.f32 %v1171_v17, %v1154_v4 }
 0xd85   : > { %v1177_v20 = vsub.f32 %v1148_v62, %v1175_v18 }
 0xd86   : > { %v1176_v22 = vsub.f32 %v1143_v0, %v1174_v19 }
 0xd87   : > { %1179 = vst.msk [vmem:[%s190_s14 + $0x8] sm:$0xff] %vm1151_vm3, %v1177_v20 }
 0xd88   : > { %1178 = vst.msk [vmem:[%s190_s14] sm:$0xff] %vm1151_vm3, %v1176_v22 }
 0xd89 PF: > { %s13_s12 = sadd.s32 1, %s1493_s12  }
 0xd8a   : > { %p10_p4 = scmp.ge.s32.totalorder %s13_s12, 10  }
 0xd8c   :  { %12 = sbr.rel (!%p10_p4) target bundleno = 1 (0x1), region = 65 }

</bundles_post_ra>
